<compile_context>
chip_gen: v7x
topology: tpu7x:2x2x1
jax: 0.10.0
libtpu: 0.0.40
codegen_flags: <defaults>
</compile_context>

<pallas_src>
import math
from functools import partial

import jax
import jax.numpy as jnp
from jax import lax
from jax.experimental import pallas as pl
from jax.experimental.pallas import tpu as pltpu


def ktrained_kernel(x_ref, w1_ref, wh_ref, bh_ref, w6T_ref, dkT_ref, *, acts_bf16):
    f32, bf16 = jnp.float32, jnp.bfloat16

    xb = x_ref[...].astype(bf16)          # (Bt, D) input tile, cast once for the MXU
    w1b = w1_ref[...]                     # (H, D)    bf16 (pre-cast once in the wrapper)
    whb = wh_ref[...]                     # (4, H, H) bf16

    def mm(w_bf, a):
        # (out, in) @ (in, Bt): bf16 operands, f32 accumulation on the MXU.
        return lax.dot_general(w_bf, a.astype(bf16),
                               (((1,), (0,)), ((), ())),
                               preferred_element_type=f32)

    def mm_t(w_bf, gz):
        # W^T @ gz: contract the "out" axis of W with the "out" axis of gz.
        return lax.dot_general(w_bf, gz.astype(bf16),
                               (((0,), (0,)), ((), ())),
                               preferred_element_type=f32)

    def sigmoid(z):
        # single EUP op (tanh) instead of exp + divide
        return 0.5 * (1.0 + jnp.tanh(0.5 * z))

    # ---- forward: 5 sigmoid blocks (activations kept for the backward sweep).
    # Layer 1 contracts the feature axis of the (Bt, D) block directly, so no
    # x^T is ever built in the wrapper or the kernel.
    z = lax.dot_general(w1b, xb, (((1,), (1,)), ((), ())),
                        preferred_element_type=f32)          # (H, Bt)
    acts = []
    a = sigmoid(z + bh_ref[0])
    acts.append(a.astype(bf16) if acts_bf16 else a)
    for j in range(4):
        a = sigmoid(mm(whb[j], a) + bh_ref[j + 1])
        acts.append(a.astype(bf16) if acts_bf16 else a)
    # K = w6 . a5 + b6 is never materialized: the module only returns grad(K.sum()).

    # ---- backward: d(sum K)/dx, hand-rolled reverse sweep (f32 elementwise) ----
    g = w6T_ref[...]                                          # (H, 1) seed, broadcasts over lanes
    for j in range(3, -1, -1):
        af = acts[j + 1].astype(f32)
        gz = g * af * (1.0 - af)                              # through sigmoid
        g = mm_t(whb[j], gz)                                  # (H, Bt)
    af = acts[0].astype(f32)
    gz = g * af * (1.0 - af)
    dkT_ref[...] = mm_t(w1b, gz).astype(dkT_ref.dtype)        # (D, Bt) lane-dense store


# ----------------------------------------------------------------------------
# Wrapper-side helpers
# ----------------------------------------------------------------------------
def _num_tensorcores_per_chip():
    """Best-effort detection of TensorCores visible to one Pallas call."""
    try:
        kind = jax.devices()[0].device_kind.lower()
    except Exception:
        return 1
    return 2 if "v7" in kind else 1   # v7x: 2 TCs/chip sharded via "parallel" grid axes


def _pick_block_b(b_pad_128):
    """Pick the batch tile (lane) width.

    * >= 128 lanes (vreg lane width), 256 where possible (v6e/v7x MXU width)
    * at least `n_tc` grid steps so every TensorCore gets a tile on v7x
    * capped at 256 so the five saved f32 activations stay in vregs (no spill);
      larger tiles can be requested explicitly (bf16-saved activations kick in).
    """
    n_tc = _num_tensorcores_per_chip()
    cap = max(128, min(256, b_pad_128 // n_tc))
    for bb in (256, 128):
        if bb <= cap and b_pad_128 % bb == 0:
            return bb
    return 128


def pack_params(params):
    """One-time param packing (hoisted off the per-call hot path).

    Stacks the 4 hidden weights / 5 biases, transposes w6 and pre-casts the
    MXU weight operands to bf16 (halves param DMA bytes, removes per-step casts).
    """
    return {
        "w1": params["w1"].astype(jnp.bfloat16),                              # (H, D)
        "wh": jnp.stack([params[f"w{i}"] for i in range(2, 6)]
                        ).astype(jnp.bfloat16),                               # (4, H, H)
        "bh": jnp.stack([params[f"b{i}"] for i in range(1, 6)]
                        )[:, :, None].astype(jnp.float32),                    # (5, H, 1)
        "w6T": params["w6"].T.astype(jnp.float32),                            # (H, 1)
        # b6 does not affect dK and is intentionally not packed.
    }


def init_params(key, N, hidden_dim, dtype=jnp.float32):
    """Deterministic init mirroring the PyTorch module (PyTorch layouts).

    Linear weights ~ U(-sqrt(6/in), sqrt(6/in)) (as in KTrained.__init__),
    biases ~ U(-1/sqrt(in), 1/sqrt(in)) (nn.Linear default).
    Weights stored in PyTorch (out, in) layout, biases as (out,).
    """
    D = 2 * N
    dims = [(hidden_dim, D)] + [(hidden_dim, hidden_dim)] * 4 + [(1, hidden_dim)]
    params = {}
    keys = jax.random.split(key, 12)
    for i, (dout, din) in enumerate(dims):
        wb = math.sqrt(6.0 / din)
        bb = 1.0 / math.sqrt(din)
        params[f"w{i + 1}"] = jax.random.uniform(
            keys[2 * i], (dout, din), dtype, minval=-wb, maxval=wb)
        params[f"b{i + 1}"] = jax.random.uniform(
            keys[2 * i + 1], (dout,), dtype, minval=-bb, maxval=bb)
    return params


def ktrained_forward(x, packed, *, block_b=None):
    """x: (B, 1, 2N) float32 -> dK: (B, 1, 2N) float32 (== module forward)."""
    orig_shape = x.shape
    B = x.shape[0]
    D = x.shape[-1]
    x2d = x.reshape(B, D).astype(jnp.float32)

    if block_b is None:
        block_b = _pick_block_b(((B + 127) // 128) * 128)
    B_pad = ((B + block_b - 1) // block_b) * block_b
    if B_pad != B:
        x2d = jnp.pad(x2d, ((0, B_pad - B), (0, 0)))

    w1, wh, bh, w6T = packed["w1"], packed["wh"], packed["bh"], packed["w6T"]
    grid = (B_pad // block_b,)

    in_specs = [
        pl.BlockSpec((block_b, D), lambda i: (i, 0)),    # batch tile of x (no wrapper x.T)
        pl.BlockSpec(w1.shape, lambda i: (0, 0)),        # params: full array every step
        pl.BlockSpec(wh.shape, lambda i: (0, 0, 0)),
        pl.BlockSpec(bh.shape, lambda i: (0, 0, 0)),
        pl.BlockSpec(w6T.shape, lambda i: (0, 0)),
    ]
    out_spec = pl.BlockSpec((D, block_b), lambda i: (0, i))  # lane-dense dK^T tile

    kernel = partial(ktrained_kernel, acts_bf16=(block_b > 256))

    dkT = pl.pallas_call(
        kernel,
        out_shape=jax.ShapeDtypeStruct((D, B_pad), jnp.float32),
        grid_spec=pltpu.PrefetchScalarGridSpec(
            num_scalar_prefetch=0,
            grid=grid,
            in_specs=in_specs,
            out_specs=out_spec,
        ),
        compiler_params=pltpu.CompilerParams(
            dimension_semantics=("parallel",)),          # shards batch tiles across TCs (v7x)
    )(x2d, w1, wh, bh, w6T)

    # Single boundary transpose (required anyway to return the module's (B,1,2N)
    # shape); padded columns of dkT are dropped here and never read.
    dk2d = dkT.T[:B]
    return dk2d.reshape(orig_shape)


# ---- pure-JAX reference (f32 autodiff) for a correctness check ----
def _mlp_ref(x2d, p):
    a = x2d
    for i in range(1, 6):
        a = jax.nn.sigmoid(a @ p[f"w{i}"].T + p[f"b{i}"])
    return a @ p["w6"].T + p["b6"]                       # (B, 1)


def _dk_ref(x, p):
    B, _, D = x.shape
    x2d = x.reshape(B, D)
    g = jax.grad(lambda xx: _mlp_ref(xx, p).sum())(x2d)
    return g.reshape(x.shape)


if __name__ == "__main__":
    N = 4            # -> input feature dim 2N = 8
    hidden_dim = 32
    B = 256          # single 256-lane tile (grid=(1,)) on v5e/v6e; 2 x 128 on v7x

    key = jax.random.PRNGKey(0)
    kx, kp = jax.random.split(key)
    params = init_params(kp, N, hidden_dim)
    packed = pack_params(params)          # hoisted off the per-call hot path
    x = jax.random.normal(kx, (B, 1, 2 * N), dtype=jnp.float32)

    dk = ktrained_forward(x, packed)
    jax.block_until_ready(dk)

    ref = _dk_ref(x, params)
    assert dk.shape == x.shape
    # bf16 MXU operands (f32 accumulation) over 10 chained matmuls vs pure-f32
    # autodiff: compare with a max-normalized tolerance instead of 1e-5.
    err = jnp.max(jnp.abs(dk - ref))
    scale = jnp.max(jnp.abs(ref))
    assert err <= 5e-2 * scale + 1e-5, "mismatch vs JAX autodiff reference"

    print("KERNEL_OK")
</pallas_src>

<mosaic_0001>
module attributes {stable_mosaic.version = 11 : i64} {
  func.func @ktrained_kernel(%arg0: i32, %arg1: memref<256x8xf32, #tpu.memory_space<vmem>>, %arg2: memref<32x8xbf16, #tpu.memory_space<vmem>>, %arg3: memref<4x32x32xbf16, #tpu.memory_space<vmem>>, %arg4: memref<5x32x1xf32, #tpu.memory_space<vmem>>, %arg5: memref<32x1xf32, #tpu.memory_space<vmem>>, %arg6: memref<8x256xf32, #tpu.memory_space<vmem>>) attributes {dimension_semantics = [#tpu.dimension_semantics<parallel>], iteration_bounds = array<i64: 1>, scalar_prefetch = 0 : i64, scratch_operands = 0 : i64, tpu.core_type = #tpu.core_type<tc>, window_params = [{transform_indices = @transform_0, window_bounds = array<i64: 256, 8>}, {pipeline_mode = #tpu.pipeline_mode<synchronous>, transform_indices = @transform_1, window_bounds = array<i64: 32, 8>}, {pipeline_mode = #tpu.pipeline_mode<synchronous>, transform_indices = @transform_2, window_bounds = array<i64: 4, 32, 32>}, {pipeline_mode = #tpu.pipeline_mode<synchronous>, transform_indices = @transform_3, window_bounds = array<i64: 5, 32, 1>}, {pipeline_mode = #tpu.pipeline_mode<synchronous>, transform_indices = @transform_4, window_bounds = array<i64: 32, 1>}, {transform_indices = @transform_5, window_bounds = array<i64: 8, 256>}]} {
    %c0 = arith.constant 0 : index
    %c0_0 = arith.constant 0 : index
    %0 = vector.load %arg1[%c0, %c0_0] : memref<256x8xf32, #tpu.memory_space<vmem>>, vector<256x8xf32>
    %1 = arith.truncf %0 : vector<256x8xf32> to vector<256x8xbf16>
    %c0_1 = arith.constant 0 : index
    %c0_2 = arith.constant 0 : index
    %2 = vector.load %arg2[%c0_1, %c0_2] : memref<32x8xbf16, #tpu.memory_space<vmem>>, vector<32x8xbf16>
    %c0_3 = arith.constant 0 : index
    %c0_4 = arith.constant 0 : index
    %c0_5 = arith.constant 0 : index
    %3 = vector.load %arg3[%c0_3, %c0_4, %c0_5] : memref<4x32x32xbf16, #tpu.memory_space<vmem>>, vector<4x32x32xbf16>
    %cst = arith.constant dense<0.000000e+00> : vector<32x256xf32>
    %4 = tpu.matmul %2, %1, %cst {dimension_numbers = #tpu.dot_dimension_numbers<[1], [1], [0], [0], [0, 0, 1, 0], [], []>} : vector<32x8xbf16>, vector<256x8xbf16>, vector<32x256xf32> -> vector<32x256xf32>
    %c0_6 = arith.constant 0 : index
    %c0_7 = arith.constant 0 : index
    %c0_8 = arith.constant 0 : index
    %5 = vector.load %arg4[%c0_6, %c0_7, %c0_8] : memref<5x32x1xf32, #tpu.memory_space<vmem>>, vector<1x32x1xf32>
    %6 = vector.shape_cast %5 : vector<1x32x1xf32> to vector<32x1xf32>
    %7 = vector.broadcast %6 : vector<32x1xf32> to vector<32x256xf32>
    %8 = arith.addf %4, %7 : vector<32x256xf32>
    %cst_9 = arith.constant 5.000000e-01 : f32
    %9 = vector.broadcast %cst_9 : f32 to vector<32x256xf32>
    %10 = arith.mulf %9, %8 : vector<32x256xf32>
    %11 = math.tanh %10 : vector<32x256xf32>
    %cst_10 = arith.constant 1.000000e+00 : f32
    %12 = vector.broadcast %cst_10 : f32 to vector<32x256xf32>
    %13 = arith.addf %12, %11 : vector<32x256xf32>
    %cst_11 = arith.constant 5.000000e-01 : f32
    %14 = vector.broadcast %cst_11 : f32 to vector<32x256xf32>
    %15 = arith.mulf %14, %13 : vector<32x256xf32>
    %16 = vector.extract_strided_slice %3 {offsets = [0, 0, 0], sizes = [1, 32, 32], strides = [1, 1, 1]} : vector<4x32x32xbf16> to vector<1x32x32xbf16>
    %17 = vector.shape_cast %16 : vector<1x32x32xbf16> to vector<32x32xbf16>
    %18 = arith.truncf %15 : vector<32x256xf32> to vector<32x256xbf16>
    %cst_12 = arith.constant dense<0.000000e+00> : vector<32x256xf32>
    %19 = tpu.matmul %17, %18, %cst_12 {dimension_numbers = #tpu.dot_dimension_numbers<[1], [0], [0], [1], [0, 0, 1, 1], [], []>} : vector<32x32xbf16>, vector<32x256xbf16>, vector<32x256xf32> -> vector<32x256xf32>
    %c1 = arith.constant 1 : index
    %c0_13 = arith.constant 0 : index
    %c0_14 = arith.constant 0 : index
    %20 = vector.load %arg4[%c1, %c0_13, %c0_14] : memref<5x32x1xf32, #tpu.memory_space<vmem>>, vector<1x32x1xf32>
    %21 = vector.shape_cast %20 : vector<1x32x1xf32> to vector<32x1xf32>
    %22 = vector.broadcast %21 : vector<32x1xf32> to vector<32x256xf32>
    %23 = arith.addf %19, %22 : vector<32x256xf32>
    %cst_15 = arith.constant 5.000000e-01 : f32
    %24 = vector.broadcast %cst_15 : f32 to vector<32x256xf32>
    %25 = arith.mulf %24, %23 : vector<32x256xf32>
    %26 = math.tanh %25 : vector<32x256xf32>
    %cst_16 = arith.constant 1.000000e+00 : f32
    %27 = vector.broadcast %cst_16 : f32 to vector<32x256xf32>
    %28 = arith.addf %27, %26 : vector<32x256xf32>
    %cst_17 = arith.constant 5.000000e-01 : f32
    %29 = vector.broadcast %cst_17 : f32 to vector<32x256xf32>
    %30 = arith.mulf %29, %28 : vector<32x256xf32>
    %31 = vector.extract_strided_slice %3 {offsets = [1, 0, 0], sizes = [1, 32, 32], strides = [1, 1, 1]} : vector<4x32x32xbf16> to vector<1x32x32xbf16>
    %32 = vector.shape_cast %31 : vector<1x32x32xbf16> to vector<32x32xbf16>
    %33 = arith.truncf %30 : vector<32x256xf32> to vector<32x256xbf16>
    %cst_18 = arith.constant dense<0.000000e+00> : vector<32x256xf32>
    %34 = tpu.matmul %32, %33, %cst_18 {dimension_numbers = #tpu.dot_dimension_numbers<[1], [0], [0], [1], [0, 0, 1, 1], [], []>} : vector<32x32xbf16>, vector<32x256xbf16>, vector<32x256xf32> -> vector<32x256xf32>
    %c2 = arith.constant 2 : index
    %c0_19 = arith.constant 0 : index
    %c0_20 = arith.constant 0 : index
    %35 = vector.load %arg4[%c2, %c0_19, %c0_20] : memref<5x32x1xf32, #tpu.memory_space<vmem>>, vector<1x32x1xf32>
    %36 = vector.shape_cast %35 : vector<1x32x1xf32> to vector<32x1xf32>
    %37 = vector.broadcast %36 : vector<32x1xf32> to vector<32x256xf32>
    %38 = arith.addf %34, %37 : vector<32x256xf32>
    %cst_21 = arith.constant 5.000000e-01 : f32
    %39 = vector.broadcast %cst_21 : f32 to vector<32x256xf32>
    %40 = arith.mulf %39, %38 : vector<32x256xf32>
    %41 = math.tanh %40 : vector<32x256xf32>
    %cst_22 = arith.constant 1.000000e+00 : f32
    %42 = vector.broadcast %cst_22 : f32 to vector<32x256xf32>
    %43 = arith.addf %42, %41 : vector<32x256xf32>
    %cst_23 = arith.constant 5.000000e-01 : f32
    %44 = vector.broadcast %cst_23 : f32 to vector<32x256xf32>
    %45 = arith.mulf %44, %43 : vector<32x256xf32>
    %46 = vector.extract_strided_slice %3 {offsets = [2, 0, 0], sizes = [1, 32, 32], strides = [1, 1, 1]} : vector<4x32x32xbf16> to vector<1x32x32xbf16>
    %47 = vector.shape_cast %46 : vector<1x32x32xbf16> to vector<32x32xbf16>
    %48 = arith.truncf %45 : vector<32x256xf32> to vector<32x256xbf16>
    %cst_24 = arith.constant dense<0.000000e+00> : vector<32x256xf32>
    %49 = tpu.matmul %47, %48, %cst_24 {dimension_numbers = #tpu.dot_dimension_numbers<[1], [0], [0], [1], [0, 0, 1, 1], [], []>} : vector<32x32xbf16>, vector<32x256xbf16>, vector<32x256xf32> -> vector<32x256xf32>
    %c3 = arith.constant 3 : index
    %c0_25 = arith.constant 0 : index
    %c0_26 = arith.constant 0 : index
    %50 = vector.load %arg4[%c3, %c0_25, %c0_26] : memref<5x32x1xf32, #tpu.memory_space<vmem>>, vector<1x32x1xf32>
    %51 = vector.shape_cast %50 : vector<1x32x1xf32> to vector<32x1xf32>
    %52 = vector.broadcast %51 : vector<32x1xf32> to vector<32x256xf32>
    %53 = arith.addf %49, %52 : vector<32x256xf32>
    %cst_27 = arith.constant 5.000000e-01 : f32
    %54 = vector.broadcast %cst_27 : f32 to vector<32x256xf32>
    %55 = arith.mulf %54, %53 : vector<32x256xf32>
    %56 = math.tanh %55 : vector<32x256xf32>
    %cst_28 = arith.constant 1.000000e+00 : f32
    %57 = vector.broadcast %cst_28 : f32 to vector<32x256xf32>
    %58 = arith.addf %57, %56 : vector<32x256xf32>
    %cst_29 = arith.constant 5.000000e-01 : f32
    %59 = vector.broadcast %cst_29 : f32 to vector<32x256xf32>
    %60 = arith.mulf %59, %58 : vector<32x256xf32>
    %61 = vector.extract_strided_slice %3 {offsets = [3, 0, 0], sizes = [1, 32, 32], strides = [1, 1, 1]} : vector<4x32x32xbf16> to vector<1x32x32xbf16>
    %62 = vector.shape_cast %61 : vector<1x32x32xbf16> to vector<32x32xbf16>
    %63 = arith.truncf %60 : vector<32x256xf32> to vector<32x256xbf16>
    %cst_30 = arith.constant dense<0.000000e+00> : vector<32x256xf32>
    %64 = tpu.matmul %62, %63, %cst_30 {dimension_numbers = #tpu.dot_dimension_numbers<[1], [0], [0], [1], [0, 0, 1, 1], [], []>} : vector<32x32xbf16>, vector<32x256xbf16>, vector<32x256xf32> -> vector<32x256xf32>
    %c4 = arith.constant 4 : index
    %c0_31 = arith.constant 0 : index
    %c0_32 = arith.constant 0 : index
    %65 = vector.load %arg4[%c4, %c0_31, %c0_32] : memref<5x32x1xf32, #tpu.memory_space<vmem>>, vector<1x32x1xf32>
    %66 = vector.shape_cast %65 : vector<1x32x1xf32> to vector<32x1xf32>
    %67 = vector.broadcast %66 : vector<32x1xf32> to vector<32x256xf32>
    %68 = arith.addf %64, %67 : vector<32x256xf32>
    %cst_33 = arith.constant 5.000000e-01 : f32
    %69 = vector.broadcast %cst_33 : f32 to vector<32x256xf32>
    %70 = arith.mulf %69, %68 : vector<32x256xf32>
    %71 = math.tanh %70 : vector<32x256xf32>
    %cst_34 = arith.constant 1.000000e+00 : f32
    %72 = vector.broadcast %cst_34 : f32 to vector<32x256xf32>
    %73 = arith.addf %72, %71 : vector<32x256xf32>
    %cst_35 = arith.constant 5.000000e-01 : f32
    %74 = vector.broadcast %cst_35 : f32 to vector<32x256xf32>
    %75 = arith.mulf %74, %73 : vector<32x256xf32>
    %c0_36 = arith.constant 0 : index
    %c0_37 = arith.constant 0 : index
    %76 = vector.load %arg5[%c0_36, %c0_37] : memref<32x1xf32, #tpu.memory_space<vmem>>, vector<32x1xf32>
    %77 = vector.broadcast %76 : vector<32x1xf32> to vector<32x256xf32>
    %78 = arith.mulf %77, %75 : vector<32x256xf32>
    %cst_38 = arith.constant 1.000000e+00 : f32
    %79 = vector.broadcast %cst_38 : f32 to vector<32x256xf32>
    %80 = arith.subf %79, %75 : vector<32x256xf32>
    %81 = arith.mulf %78, %80 : vector<32x256xf32>
    %82 = vector.extract_strided_slice %3 {offsets = [3, 0, 0], sizes = [1, 32, 32], strides = [1, 1, 1]} : vector<4x32x32xbf16> to vector<1x32x32xbf16>
    %83 = vector.shape_cast %82 : vector<1x32x32xbf16> to vector<32x32xbf16>
    %84 = arith.truncf %81 : vector<32x256xf32> to vector<32x256xbf16>
    %cst_39 = arith.constant dense<0.000000e+00> : vector<32x256xf32>
    %85 = tpu.matmul %83, %84, %cst_39 {dimension_numbers = #tpu.dot_dimension_numbers<[0], [0], [1], [1], [0, 1, 1, 1], [], []>} : vector<32x32xbf16>, vector<32x256xbf16>, vector<32x256xf32> -> vector<32x256xf32>
    %86 = arith.mulf %85, %60 : vector<32x256xf32>
    %cst_40 = arith.constant 1.000000e+00 : f32
    %87 = vector.broadcast %cst_40 : f32 to vector<32x256xf32>
    %88 = arith.subf %87, %60 : vector<32x256xf32>
    %89 = arith.mulf %86, %88 : vector<32x256xf32>
    %90 = vector.extract_strided_slice %3 {offsets = [2, 0, 0], sizes = [1, 32, 32], strides = [1, 1, 1]} : vector<4x32x32xbf16> to vector<1x32x32xbf16>
    %91 = vector.shape_cast %90 : vector<1x32x32xbf16> to vector<32x32xbf16>
    %92 = arith.truncf %89 : vector<32x256xf32> to vector<32x256xbf16>
    %cst_41 = arith.constant dense<0.000000e+00> : vector<32x256xf32>
    %93 = tpu.matmul %91, %92, %cst_41 {dimension_numbers = #tpu.dot_dimension_numbers<[0], [0], [1], [1], [0, 1, 1, 1], [], []>} : vector<32x32xbf16>, vector<32x256xbf16>, vector<32x256xf32> -> vector<32x256xf32>
    %94 = arith.mulf %93, %45 : vector<32x256xf32>
    %cst_42 = arith.constant 1.000000e+00 : f32
    %95 = vector.broadcast %cst_42 : f32 to vector<32x256xf32>
    %96 = arith.subf %95, %45 : vector<32x256xf32>
    %97 = arith.mulf %94, %96 : vector<32x256xf32>
    %98 = vector.extract_strided_slice %3 {offsets = [1, 0, 0], sizes = [1, 32, 32], strides = [1, 1, 1]} : vector<4x32x32xbf16> to vector<1x32x32xbf16>
    %99 = vector.shape_cast %98 : vector<1x32x32xbf16> to vector<32x32xbf16>
    %100 = arith.truncf %97 : vector<32x256xf32> to vector<32x256xbf16>
    %cst_43 = arith.constant dense<0.000000e+00> : vector<32x256xf32>
    %101 = tpu.matmul %99, %100, %cst_43 {dimension_numbers = #tpu.dot_dimension_numbers<[0], [0], [1], [1], [0, 1, 1, 1], [], []>} : vector<32x32xbf16>, vector<32x256xbf16>, vector<32x256xf32> -> vector<32x256xf32>
    %102 = arith.mulf %101, %30 : vector<32x256xf32>
    %cst_44 = arith.constant 1.000000e+00 : f32
    %103 = vector.broadcast %cst_44 : f32 to vector<32x256xf32>
    %104 = arith.subf %103, %30 : vector<32x256xf32>
    %105 = arith.mulf %102, %104 : vector<32x256xf32>
    %106 = vector.extract_strided_slice %3 {offsets = [0, 0, 0], sizes = [1, 32, 32], strides = [1, 1, 1]} : vector<4x32x32xbf16> to vector<1x32x32xbf16>
    %107 = vector.shape_cast %106 : vector<1x32x32xbf16> to vector<32x32xbf16>
    %108 = arith.truncf %105 : vector<32x256xf32> to vector<32x256xbf16>
    %cst_45 = arith.constant dense<0.000000e+00> : vector<32x256xf32>
    %109 = tpu.matmul %107, %108, %cst_45 {dimension_numbers = #tpu.dot_dimension_numbers<[0], [0], [1], [1], [0, 1, 1, 1], [], []>} : vector<32x32xbf16>, vector<32x256xbf16>, vector<32x256xf32> -> vector<32x256xf32>
    %110 = arith.mulf %109, %15 : vector<32x256xf32>
    %cst_46 = arith.constant 1.000000e+00 : f32
    %111 = vector.broadcast %cst_46 : f32 to vector<32x256xf32>
    %112 = arith.subf %111, %15 : vector<32x256xf32>
    %113 = arith.mulf %110, %112 : vector<32x256xf32>
    %114 = arith.truncf %113 : vector<32x256xf32> to vector<32x256xbf16>
    %cst_47 = arith.constant dense<0.000000e+00> : vector<8x256xf32>
    %115 = tpu.matmul %2, %114, %cst_47 {dimension_numbers = #tpu.dot_dimension_numbers<[0], [0], [1], [1], [0, 1, 1, 1], [], []>} : vector<32x8xbf16>, vector<32x256xbf16>, vector<8x256xf32> -> vector<8x256xf32>
    %c0_48 = arith.constant 0 : index
    %c0_49 = arith.constant 0 : index
    %116 = vector.load %arg6[%c0_48, %c0_49] : memref<8x256xf32, #tpu.memory_space<vmem>>, vector<8x256xf32>
    tpu.vector_store %arg6[%c0_48, %c0_49], %115 {strides = array<i32>} : memref<8x256xf32, #tpu.memory_space<vmem>>, vector<8x256xf32>,
    return
  }
  func.func @transform_0(%arg0: i32) -> (i32, i32) {
    %c0_i32 = arith.constant 0 : i32
    %c0_i32_0 = arith.constant 0 : i32
    return %arg0, %c0_i32 : i32, i32
  }
  func.func @transform_1(%arg0: i32) -> (i32, i32) {
    %c0_i32 = arith.constant 0 : i32
    %c0_i32_0 = arith.constant 0 : i32
    %c0_i32_1 = arith.constant 0 : i32
    return %c0_i32, %c0_i32_0 : i32, i32
  }
  func.func @transform_2(%arg0: i32) -> (i32, i32, i32) {
    %c0_i32 = arith.constant 0 : i32
    %c0_i32_0 = arith.constant 0 : i32
    %c0_i32_1 = arith.constant 0 : i32
    %c0_i32_2 = arith.constant 0 : i32
    return %c0_i32, %c0_i32_0, %c0_i32_1 : i32, i32, i32
  }
  func.func @transform_3(%arg0: i32) -> (i32, i32, i32) {
    %c0_i32 = arith.constant 0 : i32
    %c0_i32_0 = arith.constant 0 : i32
    %c0_i32_1 = arith.constant 0 : i32
    %c0_i32_2 = arith.constant 0 : i32
    return %c0_i32, %c0_i32_0, %c0_i32_1 : i32, i32, i32
  }
  func.func @transform_4(%arg0: i32) -> (i32, i32) {
    %c0_i32 = arith.constant 0 : i32
    %c0_i32_0 = arith.constant 0 : i32
    %c0_i32_1 = arith.constant 0 : i32
    return %c0_i32, %c0_i32_0 : i32, i32
  }
  func.func @transform_5(%arg0: i32) -> (i32, i32) {
    %c0_i32 = arith.constant 0 : i32
    %c0_i32_0 = arith.constant 0 : i32
    return %c0_i32, %arg0 : i32, i32
  }
}

</mosaic_0001>

<bundles_post_ra>
// kernel: tpu_custom_call.1
= control target key start
LH: loop header
LB: loop body
LE: loop exit
PB: predicated region body
PF: predicated region fallthrough
CT: control target
= control target key end

     0   :  { %vm124_vm0 = vcmask 64512   ;;  %v1526_v7 = vmov 0   ;;  %s2026_s0 = inlined_call_operand.vmem [shape: f32[256,8], index: 0, kind: input, shape index: {}]   ;;  %s2027_s1 = inlined_call_operand.vmem [shape: bf16[32,8], index: 1, kind: input, shape index: {}]   ;;  %s2028_s2 = inlined_call_operand.vmem [shape: bf16[4,32,32], index: 2, kind: input, shape index: {}]   ;;  %s2029_s3 = inlined_call_operand.vmem [shape: f32[5,32,1], index: 3, kind: input, shape index: {}]   ;;  %s2030_s4 = inlined_call_operand.vmem [shape: f32[32,1], index: 4, kind: input, shape index: {}]   ;;  %s2031_s5 = inlined_call_operand.hbm [shape: f32[8,256], index: 5, kind: output, shape index: {}]  }
   0x1   :  { %v38_v0 = vld [vmem:[%s2026_s0 + $0x80] sm:$0xff]  ;;  %v39_v1 = vld [vmem:[%s2026_s0 + $0x88] sm:$0xff]  ;;  %v40_v5 = vld [vmem:[%s2026_s0 + $0x90] sm:$0xff]  ;;  %1410 = vset.pattern.permute.xlu0 %v1526_v7  ;;  %1411 = vset.pattern.permute.xlu1 %v1526_v7 }
   0x2   :  { %v22_v2 = vld [vmem:[%s2026_s0] sm:$0xff]  ;;  %v62_v3 = vpack.c.bf16 %v39_v1, %v38_v0  ;;  %v23_v4 = vld [vmem:[%s2026_s0 + $0x8] sm:$0xff]  ;;  %v41_v6 = vld [vmem:[%s2026_s0 + $0x98] sm:$0xff]  ;;  %342 = vmatprep.mubr.bf16.mxu1 %v1526_v7 }
   0x3   :  { %v54_v8 = vpack.c.bf16 %v23_v4, %v22_v2  ;;  %v63_v9 = vpack.c.bf16 %v41_v6, %v40_v5  ;;  %v24_v10 = vld [vmem:[%s2026_s0 + $0x10] sm:$0xff]  ;;  %v25_v11 = vld [vmem:[%s2026_s0 + $0x18] sm:$0xff]  ;;  %v42_v14 = vld [vmem:[%s2026_s0 + $0xa0] sm:$0xff] }
   0x4   :  { %1400 = vmatprep.subr.msk.bf16.mxu0 %vm124_vm0, %v62_v3  ;;  %v55_v13 = vpack.c.bf16 %v25_v11, %v24_v10  ;;  %v43_v15 = vld [vmem:[%s2026_s0 + $0xa8] sm:$0xff]  ;;  %v26_v18 = vld [vmem:[%s2026_s0 + $0x20] sm:$0xff]  ;;  %v92_v22 = vld [vmem:[%s2029_s3 + $0x10] sm:$0xff] }
   0x5   :  { %v132_v12 = vsel %vm124_vm0, %v54_v8, 0  ;;  %v64_v17 = vpack.c.bf16 %v43_v15, %v42_v14  ;;  %v27_v19 = vld [vmem:[%s2026_s0 + $0x28] sm:$0xff]  ;;  %v1604_v20 = vld [vmem:[%s2027_s1] sm:$0xff]   ;;  %v44_v24 = vld [vmem:[%s2026_s0 + $0xb0] sm:$0xff]  ;;  %106 = vperm.xlu1 %1411, %v92_v22  }
   0x6   :  { %1381 = vmatpush3.bf16.xpose.msra.mxu0 %v132_v12  ;;  %v135_v16 = vsel %vm124_vm0, %v55_v13, 0  ;;  %v90_v21 = vld [vmem:[%s2029_s3] sm:$0xff]  ;;  %1396 = vmatprep.mubr.msk.bf16.mxu0 %vm124_vm0, %v1604_v20  ;;  %v56_v23 = vpack.c.bf16 %v27_v19, %v26_v18  ;;  %v45_v25 = vld [vmem:[%s2026_s0 + $0xb8] sm:$0xff]  ;;  %v91_v26 = vld [vmem:[%s2029_s3 + $0x8] sm:$0xff] }
   0x7   :  { %1401 = vmatprep.subr.msk.bf16.mxu0 %vm124_vm0, %v63_v9  ;;  %96 = vperm.xlu0 %1410, %v90_v21   ;;  %v93_v27 = vld [vmem:[%s2029_s3 + $0x18] sm:$0xff]  ;;  %v65_v29 = vpack.c.bf16 %v45_v25, %v44_v24  ;;  %v28_v30 = vld [vmem:[%s2026_s0 + $0x30] sm:$0xff]  ;;  %v1339_v32 = vld [vmem:[%s2029_s3 + $0x20] sm:$0xff] }
   0x8   :  { %v138_v28 = vsel %vm124_vm0, %v56_v23, 0  ;;  %v29_v31 = vld [vmem:[%s2026_s0 + $0x38] sm:$0xff]  ;;  %v1340_v33 = vld [vmem:[%s2029_s3 + $0x28] sm:$0xff]  ;;  %v46_v34 = vld [vmem:[%s2026_s0 + $0xc0] sm:$0xff] }
   0x9   :  { %111 = vperm.xlu1 %1411, %v93_v27   ;;  %v47_v35 = vld [vmem:[%s2026_s0 + $0xc8] sm:$0xff]  ;;  %v1341_v36 = vld [vmem:[%s2029_s3 + $0x30] sm:$0xff]  ;;  %v57_v37 = vpack.c.bf16 %v29_v31, %v28_v30  ;;  %v1342_v38 = vld [vmem:[%s2029_s3 + $0x38] sm:$0xff] }
   0xa   :  { %v66_v40 = vpack.c.bf16 %v47_v35, %v46_v34 }
   0xb   :  { %101 = vperm.xlu0 %1410, %v91_v26   ;;  %v141_v39 = vsel %vm124_vm0, %v57_v37, 0 }
   0xd   :  { %280 = vperm.xlu1 %1411, %v1340_v33  }
   0xe   :  { %1383 = vmatpush3.bf16.xpose.msra.mxu0 %v135_v16 }
   0xf   :  { %1402 = vmatprep.subr.msk.bf16.mxu0 %vm124_vm0, %v64_v17  ;;  %275 = vperm.xlu0 %1410, %v1339_v32  }
  0x13   :  { %285 = vperm.xlu0 %1410, %v1341_v36  }
  0x16   :  { %1385 = vmatpush3.bf16.xpose.msra.mxu0 %v138_v28 }
  0x17   :  { %1403 = vmatprep.subr.msk.bf16.mxu0 %vm124_vm0, %v65_v29 }
  0x18   :  { %10 = vsyncpa [#allocation3], 0  ;;  %v30_v41 = vld [vmem:[%s2026_s0 + $0x40] sm:$0xff]  ;;  %v31_v42 = vld [vmem:[%s2026_s0 + $0x48] sm:$0xff]  ;;  %290 = vperm.xlu1 %1411, %v1342_v38   ;;  %vm303_vm1 = vcmask 261120  }
  0x19   :  { %v1347_v43 = vld [vmem:[%s2029_s3 + $0x40] sm:$0xff]  ;;  %v1348_v44 = vld [vmem:[%s2029_s3 + $0x48] sm:$0xff]  ;;  %v58_v45 = vpack.c.bf16 %v31_v42, %v30_v41  ;;  %v48_v46 = vld [vmem:[%s2026_s0 + $0xd0] sm:$0xff] }
  0x1a   :  { %406 = vperm.xlu0 %1410, %v1347_v43   ;;  %v49_v47 = vld [vmem:[%s2026_s0 + $0xd8] sm:$0xff]  ;;  %v1349_v48 = vld [vmem:[%s2029_s3 + $0x50] sm:$0xff]  ;;  %v1355_v54 = vld [vmem:[%s2029_s3 + $0x60] sm:$0xff] }
  0x1b   :  { %v1350_v49 = vld [vmem:[%s2029_s3 + $0x58] sm:$0xff]  ;;  %v144_v50 = vsel %vm124_vm0, %v58_v45, 0  ;;  %v67_v51 = vpack.c.bf16 %v49_v47, %v48_v46  ;;  %v32_v52 = vld [vmem:[%s2026_s0 + $0x50] sm:$0xff]  ;;  %v1356_v55 = vld [vmem:[%s2029_s3 + $0x68] sm:$0xff] }
  0x1c   :  { %411 = vperm.xlu1 %1411, %v1348_v44   ;;  %v33_v53 = vld [vmem:[%s2026_s0 + $0x58] sm:$0xff]  ;;  %v50_v57 = vld [vmem:[%s2026_s0 + $0xe0] sm:$0xff]  ;;  %v51_v58 = vld [vmem:[%s2026_s0 + $0xe8] sm:$0xff] }
  0x1d   :  { %v59_v56 = vpack.c.bf16 %v33_v53, %v32_v52  ;;  %v1357_v59 = vld [vmem:[%s2029_s3 + $0x70] sm:$0xff]  ;;  %v1358_v60 = vld [vmem:[%s2029_s3 + $0x78] sm:$0xff]  ;;  %v68_v62 = vpack.c.bf16 %v51_v58, %v50_v57  ;;  %v34_v63 = vld [vmem:[%s2026_s0 + $0x60] sm:$0xff] }
  0x1e   :  { %1387 = vmatpush3.bf16.xpose.msra.mxu0 %v141_v39  ;;  %416 = vperm.xlu0 %1410, %v1349_v48   ;;  %v35_v0 = vld [vmem:[%s2026_s0 + $0x68] sm:$0xff]  ;;  %v1363_v1 = vld [vmem:[%s2029_s3 + $0x80] sm:$0xff]  ;;  %v52_v4 = vld [vmem:[%s2026_s0 + $0xf0] sm:$0xff] }
  0x1f   :  { %1404 = vmatprep.subr.msk.bf16.mxu0 %vm124_vm0, %v66_v40  ;;  %v147_v61 = vsel %vm124_vm0, %v59_v56, 0  ;;  %v1364_v2 = vld [vmem:[%s2029_s3 + $0x88] sm:$0xff]  ;;  %v60_v3 = vpack.c.bf16 %v35_v0, %v34_v63  ;;  %v53_v5 = vld [vmem:[%s2026_s0 + $0xf8] sm:$0xff]  ;;  %v1365_v6 = vld [vmem:[%s2029_s3 + $0x90] sm:$0xff] }
  0x20   :  { %421 = vperm.xlu1 %1411, %v1350_v49   ;;  %v1366_v8 = vld [vmem:[%s2029_s3 + $0x98] sm:$0xff]  ;;  %v69_v10 = vpack.c.bf16 %v53_v5, %v52_v4  ;;  %v36_v11 = vld [vmem:[%s2026_s0 + $0x70] sm:$0xff]  ;;  %v785_v13 = vld [vmem:[%s2030_s4] sm:$0xff] }
  0x21   :  { %v150_v9 = vsel %vm124_vm0, %v60_v3, 0  ;;  %v37_v12 = vld [vmem:[%s2026_s0 + $0x78] sm:$0xff]  ;;  %v786_v14 = vld [vmem:[%s2030_s4 + $0x8] sm:$0xff]  ;;  %v787_v16 = vld [vmem:[%s2030_s4 + $0x10] sm:$0xff] }
  0x22   :  { %536 = vperm.xlu0 %1410, %v1355_v54   ;;  %v61_v15 = vpack.c.bf16 %v37_v12, %v36_v11  ;;  %v788_v17 = vld [vmem:[%s2030_s4 + $0x18] sm:$0xff]  ;;  %v1755_v19 = vld [vmem:[%s2027_s1 + $0x8] sm:$0xff]  }
  0x24   :  { %541 = vperm.xlu1 %1411, %v1356_v55   ;;  %v153_v18 = vsel %vm124_vm0, %v61_v15, 0  ;;  %v1799_v15 = vld [vmem:[%s2028_s2 + $0x8] sm:$0xff]  }
  0x26   :  { %1389 = vmatpush3.bf16.xpose.msra.mxu0 %v144_v50  ;;  %546 = vperm.xlu0 %1410, %v1357_v59  }
  0x27   :  { %1405 = vmatprep.subr.msk.bf16.mxu0 %vm124_vm0, %v67_v51 }
  0x28   :  { %551 = vperm.xlu1 %1411, %v1358_v60  }
  0x2a   :  { %666 = vperm.xlu0 %1410, %v1363_v1  }
  0x2c   :  { %671 = vperm.xlu1 %1411, %v1364_v2  }
  0x2e   :  { %1391 = vmatpush3.bf16.xpose.msra.mxu0 %v147_v61  ;;  %676 = vperm.xlu0 %1410, %v1365_v6  }
  0x2f   :  { %1406 = vmatprep.subr.msk.bf16.mxu0 %vm124_vm0, %v68_v62 }
  0x30   :  { %681 = vperm.xlu1 %1411, %v1366_v8  }
  0x32   :  { %791 = vperm.xlu0 %1410, %v785_v13  }
  0x34   :  { %796 = vperm.xlu1 %1411, %v786_v14   ;;  %v1791_v14 = vld [vmem:[%s2028_s2] sm:$0xff]  }
  0x36   :  { %1393 = vmatpush3.bf16.xpose.msra.mxu0 %v150_v9  ;;  %801 = vperm.xlu0 %1410, %v787_v16  }
  0x37   :  { %1407 = vmatprep.subr.msk.bf16.mxu0 %vm124_vm0, %v69_v10 }
  0x38   :  { %806 = vperm.xlu1 %1411, %v788_v17  }
  0x3e   :  { %1395 = vmatpush3.bf16.xpose.msra.mxu0 %v153_v18 }
  0x45   :  { %1397 = vmatmul.mubr.msk.bf16.vlgmr.msra.gmra.mrb[0].mxu0 %vm124_vm0, %v1604_v20 }
  0x46   :  { %1398 = vmatprep.mubr.msk.bf16.mxu0 %vm124_vm0, %v1755_v19 }
  0x4d   :  { %1399 = vmatmul.mubr.msk.bf16.gmra.mrb[4].mxu0 %vm124_vm0, %v1755_v19 }
  0x4e   :  { %998 = vmatprep.mubr.bf16.mxu0 %v1526_v7 }
  0x84   :  { %v107_v31 = vpop.permute.xlu1 %106 }
  0x86   :  { %v97_v21 = vpop.permute.xlu0 %96 }
  0x88   :  { %v112_v39 = vpop.permute.xlu1 %111 }
  0x8a   :  { %v102_v25 = vpop.permute.xlu0 %101 }
  0x8e   :  { %v276_v16 = vpop.permute.xlu0 %275 }
 0x118   :  { %v213_v22 = vpop.f32.mrb[0].mxu0 }
 0x119   :  { %v214_v23 = vadd.f32 %v213_v22, %v97_v21  ;;  %v215_v24 = vpop.f32.mrb[1].mxu0  ;;  %v281_v22 = vpop.permute.xlu1 %280 }
 0x11a   :  { %v216_v26 = vadd.f32 %v215_v24, %v97_v21  ;;  %v217_v27 = vpop.f32.mrb[2].mxu0 }
 0x11b   :  { %v232_v28 = vmul.f32 0.5, %v214_v23  ;;  %v218_v29 = vadd.f32 %v217_v27, %v102_v25  ;;  %v219_v30 = vpop.f32.mrb[3].mxu0 }
 0x11c   :  { %v233_v32 = vmul.f32 0.5, %v216_v26  ;;  %v220_v33 = vadd.f32 %v219_v30, %v102_v25 }
 0x11d   :  { %1422 = vtanh.f32 %v232_v28  ;;  %v234_v34 = vmul.f32 0.5, %v218_v29 }
 0x11e   :  { %1424 = vtanh.f32 %v233_v32  ;;  %v235_v35 = vmul.f32 0.5, %v220_v33  ;;  %v286_v32 = vpop.permute.xlu0 %285 }
 0x11f   :  { %1426 = vtanh.f32 %v234_v34 }
 0x120   :  { %1428 = vtanh.f32 %v235_v35  ;;  %v223_v36 = vpop.f32.mrb[4].mxu0 }
 0x121   :  { %v224_v37 = vadd.f32 %v223_v36, %v107_v31  ;;  %v225_v38 = vpop.f32.mrb[5].mxu0  ;;  %v291_v36 = vpop.permute.xlu1 %290 }
 0x122   :  { %v226_v40 = vadd.f32 %v225_v38, %v107_v31  ;;  %v227_v41 = vpop.f32.mrb[6].mxu0 }
 0x123   :  { %v236_v42 = vmul.f32 0.5, %v224_v37  ;;  %v228_v43 = vadd.f32 %v227_v41, %v112_v39  ;;  %v229_v44 = vpop.f32.mrb[7].mxu0 }
 0x124   :  { %v237_v45 = vmul.f32 0.5, %v226_v40  ;;  %v230_v46 = vadd.f32 %v229_v44, %v112_v39 }
 0x125   :  { %1430 = vtanh.f32 %v236_v42  ;;  %v238_v47 = vmul.f32 0.5, %v228_v43 }
 0x126   :  { %1432 = vtanh.f32 %v237_v45  ;;  %v239_v48 = vmul.f32 0.5, %v230_v46 }
 0x127   :  { %v1423_v49 = vpop.eup %1422  ;;  %1434 = vtanh.f32 %v238_v47 }
 0x128   :  { %v1425_v50 = vpop.eup %1424  ;;  %1436 = vtanh.f32 %v239_v48  ;;  %v248_v54 = vadd.f32 1.0, %v1423_v49 }
 0x129   :  { %v1427_v51 = vpop.eup %1426  ;;  %v249_v52 = vadd.f32 1.0, %v1425_v50 }
 0x12a   :  { %v1429_v53 = vpop.eup %1428  ;;  %v250_v55 = vadd.f32 1.0, %v1427_v51  ;;  %v1770_v60 = vmul.f32 0.5, %v248_v54 }
 0x12b   :  { %v251_v56 = vadd.f32 1.0, %v1429_v53  ;;  %v1766_v58 = vmul.f32 0.5, %v249_v52 }
 0x12c   :  { %v1764_v57 = vmul.f32 0.5, %v250_v55 }
 0x12d   :  { %v1768_v59 = vmul.f32 0.5, %v251_v56 }
 0x12e   :  { %v264_v0 = vpack.c.bf16 %v1764_v57, %v1770_v60 }
 0x12f   :  { %v1431_v61 = vpop.eup %1430  ;;  %v265_v62 = vpack.c.bf16 %v1768_v59, %v1766_v58 }
 0x130   :  { %v1433_v63 = vpop.eup %1432  ;;  %v252_v4 = vadd.f32 1.0, %v1431_v61 }
 0x131   :  { %v1435_v1 = vpop.eup %1434  ;;  %v253_v2 = vadd.f32 1.0, %v1433_v63  ;;  %310 = vmatprep.subr.bf16.mxu1 %v265_v62 }
 0x132   :  { %v1437_v3 = vpop.eup %1436  ;;  %v254_v5 = vadd.f32 1.0, %v1435_v1  ;;  %311 = vmatpush1.bf16.msra.mxu1 %v264_v0  ;;  %v1782_v11 = vmul.f32 0.5, %v252_v4 }
 0x133   :  { %v255_v6 = vadd.f32 1.0, %v1437_v3  ;;  %v1778_v9 = vmul.f32 0.5, %v253_v2 }
 0x134   :  { %v1776_v8 = vmul.f32 0.5, %v254_v5 }
 0x135   :  { %v1780_v10 = vmul.f32 0.5, %v255_v6 }
 0x136   :  { %v266_v13 = vpack.c.bf16 %v1776_v8, %v1782_v11 }
 0x137   :  { %v267_v12 = vpack.c.bf16 %v1780_v10, %v1778_v9 }
 0x139   :  { %312 = vmatprep.subr.bf16.mxu1 %v267_v12 }
 0x13a   :  { %313 = vmatpush1.bf16.msra.mxu1 %v266_v13 }
 0x13d   :  { %1345 = vmatmul.mubr.msk.bf16.vlgmr.msra.gmra.mrb[0].mxu1 %vm303_vm1, %v1791_v14 }
 0x13e   :  { %352 = vmatprep.mubr.bf16.mxu1 %v1526_v7 }
 0x145   :  { %1346 = vmatmul.mubr.msk.bf16.gmra.mrb[4].mxu1 %vm303_vm1, %v1799_v15 }
 0x146   :  { %472 = vmatprep.mubr.bf16.mxu1 %v1526_v7 }
 0x210   :  { %v344_v17 = vpop.f32.mrb[0].mxu1 }
 0x211   :  { %v345_v18 = vadd.f32 %v344_v17, %v276_v16  ;;  %v346_v21 = vpop.f32.mrb[1].mxu1 }
 0x212   :  { %v347_v23 = vadd.f32 %v346_v21, %v276_v16  ;;  %v348_v24 = vpop.f32.mrb[2].mxu1 }
 0x213   :  { %v363_v25 = vmul.f32 0.5, %v345_v18  ;;  %v349_v26 = vadd.f32 %v348_v24, %v281_v22  ;;  %v350_v27 = vpop.f32.mrb[3].mxu1  ;;  %v1839_v24 = vld [vmem:[%s2028_s2 + $0x18] sm:$0xff]  }
 0x214   :  { %v364_v28 = vmul.f32 0.5, %v347_v23  ;;  %v351_v29 = vadd.f32 %v350_v27, %v281_v22  ;;  %v1831_v23 = vld [vmem:[%s2028_s2 + $0x10] sm:$0xff]   ;;  %v407_v27 = vpop.permute.xlu0 %406 }
 0x215   :  { %1438 = vtanh.f32 %v363_v25  ;;  %v365_v30 = vmul.f32 0.5, %v349_v26  ;;  %v1847_v25 = vld [vmem:[%s2028_s2 + $0x20] sm:$0xff]   ;;  %v1853_v26 = vld [vmem:[%s2028_s2 + $0x28] sm:$0xff]  }
 0x216   :  { %1440 = vtanh.f32 %v364_v28  ;;  %v366_v31 = vmul.f32 0.5, %v351_v29  ;;  %944 = vxpose.xlu1.c.b16.start [1/2] (short) (narrow) %v1847_v25, 32 }
 0x217   :  { %1442 = vtanh.f32 %v365_v30 }
 0x218   :  { %1444 = vtanh.f32 %v366_v31  ;;  %v354_v33 = vpop.f32.mrb[4].mxu1  ;;  %v412_v31 = vpop.permute.xlu1 %411 }
 0x219   :  { %v355_v34 = vadd.f32 %v354_v33, %v286_v32  ;;  %v356_v35 = vpop.f32.mrb[5].mxu1 }
 0x21a   :  { %v357_v37 = vadd.f32 %v356_v35, %v286_v32  ;;  %v358_v38 = vpop.f32.mrb[6].mxu1  ;;  %945 = vxpose.xlu1.c.b16.end [2/2] (short) (narrow) %v1853_v26, 32 }
 0x21b   :  { %v367_v39 = vmul.f32 0.5, %v355_v34  ;;  %v359_v40 = vadd.f32 %v358_v38, %v291_v36  ;;  %v360_v41 = vpop.f32.mrb[7].mxu1 }
 0x21c   :  { %v368_v42 = vmul.f32 0.5, %v357_v37  ;;  %v361_v43 = vadd.f32 %v360_v41, %v291_v36 }
 0x21d   :  { %1446 = vtanh.f32 %v367_v39  ;;  %v369_v44 = vmul.f32 0.5, %v359_v40 }
 0x21e   :  { %1448 = vtanh.f32 %v368_v42  ;;  %v370_v45 = vmul.f32 0.5, %v361_v43  ;;  %1154 = vxpose.xlu1.c.b16.start [1/2] (short) (narrow) %v1791_v14, 32  ;;  %v417_v14 = vpop.permute.xlu0 %416  ;;  %v422_v43 = vpop.permute.xlu1 %421 }
 0x21f   :  { %v1439_v46 = vpop.eup %1438  ;;  %1450 = vtanh.f32 %v369_v44 }
 0x220   :  { %v1441_v47 = vpop.eup %1440  ;;  %1452 = vtanh.f32 %v370_v45  ;;  %v379_v51 = vadd.f32 1.0, %v1439_v46 }
 0x221   :  { %v1443_v48 = vpop.eup %1442  ;;  %v380_v49 = vadd.f32 1.0, %v1441_v47 }
 0x222   :  { %v1445_v50 = vpop.eup %1444  ;;  %v381_v52 = vadd.f32 1.0, %v1443_v48  ;;  %v1810_v61 = vmul.f32 0.5, %v379_v51  ;;  %1155 = vxpose.xlu1.c.b16.end [2/2] (short) (narrow) %v1799_v15, 32 }
 0x223   :  { %v382_v53 = vadd.f32 1.0, %v1445_v50  ;;  %v1806_v55 = vmul.f32 0.5, %v380_v49 }
 0x224   :  { %v1804_v54 = vmul.f32 0.5, %v381_v52 }
 0x225   :  { %v1808_v56 = vmul.f32 0.5, %v382_v53 }
 0x226   :  { %v395_v1 = vpack.c.bf16 %v1804_v54, %v1810_v61 }
 0x227   :  { %v1447_v62 = vpop.eup %1446  ;;  %v396_v63 = vpack.c.bf16 %v1808_v56, %v1806_v55 }
 0x228   :  { %v1449_v0 = vpop.eup %1448  ;;  %v383_v5 = vadd.f32 1.0, %v1447_v62 }
 0x229   :  { %v1451_v2 = vpop.eup %1450  ;;  %v384_v3 = vadd.f32 1.0, %v1449_v0  ;;  %440 = vmatprep.subr.bf16.mxu1 %v396_v63 }
 0x22a   :  { %v1453_v4 = vpop.eup %1452  ;;  %v385_v6 = vadd.f32 1.0, %v1451_v2  ;;  %441 = vmatpush1.bf16.msra.mxu1 %v395_v1  ;;  %v1822_v18 = vmul.f32 0.5, %v383_v5 }
 0x22b   :  { %v386_v12 = vadd.f32 1.0, %v1453_v4  ;;  %v1818_v16 = vmul.f32 0.5, %v384_v3 }
 0x22c   :  { %v1816_v13 = vmul.f32 0.5, %v385_v6 }
 0x22d   :  { %v1820_v17 = vmul.f32 0.5, %v386_v12 }
 0x22e   :  { %v397_v22 = vpack.c.bf16 %v1816_v13, %v1822_v18 }
 0x22f   :  { %v398_v21 = vpack.c.bf16 %v1820_v17, %v1818_v16 }
 0x231   :  { %442 = vmatprep.subr.bf16.mxu1 %v398_v21 }
 0x232   :  { %443 = vmatpush1.bf16.msra.mxu1 %v397_v22 }
 0x235   :  { %1353 = vmatmul.mubr.msk.bf16.vlgmr.msra.gmra.mrb[8].mxu1 %vm303_vm1, %v1831_v23 }
 0x236   :  { %482 = vmatprep.mubr.bf16.mxu1 %v1526_v7 }
 0x23d   :  { %1354 = vmatmul.mubr.msk.bf16.gmra.mrb[12].mxu1 %vm303_vm1, %v1839_v24 }
 0x23e   :  { %602 = vmatprep.mubr.bf16.mxu1 %v1526_v7 }
 0x308   :  { %v474_v28 = vpop.f32.mrb[8].mxu1 }
 0x309   :  { %v475_v29 = vadd.f32 %v474_v28, %v407_v27  ;;  %v476_v30 = vpop.f32.mrb[9].mxu1 }
 0x30a   :  { %v477_v32 = vadd.f32 %v476_v30, %v407_v27  ;;  %v478_v33 = vpop.f32.mrb[10].mxu1 }
 0x30b   :  { %v493_v34 = vmul.f32 0.5, %v475_v29  ;;  %v479_v35 = vadd.f32 %v478_v33, %v412_v31  ;;  %v480_v36 = vpop.f32.mrb[11].mxu1 }
 0x30c   :  { %v494_v37 = vmul.f32 0.5, %v477_v32  ;;  %v481_v38 = vadd.f32 %v480_v36, %v412_v31 }
 0x30d   :  { %1454 = vtanh.f32 %v493_v34  ;;  %v495_v39 = vmul.f32 0.5, %v479_v35 }
 0x30e   :  { %1456 = vtanh.f32 %v494_v37  ;;  %v496_v40 = vmul.f32 0.5, %v481_v38 }
 0x30f   :  { %1458 = vtanh.f32 %v495_v39 }
 0x310   :  { %1460 = vtanh.f32 %v496_v40  ;;  %v484_v15 = vpop.f32.mrb[12].mxu1 }
 0x311   :  { %v485_v41 = vadd.f32 %v484_v15, %v417_v14  ;;  %v486_v42 = vpop.f32.mrb[13].mxu1  ;;  %v1891_v15 = vld [vmem:[%s2028_s2 + $0x30] sm:$0xff]  }
 0x312   :  { %v487_v44 = vadd.f32 %v486_v42, %v417_v14  ;;  %v488_v45 = vpop.f32.mrb[14].mxu1  ;;  %839 = vxpose.xlu0.c.b16.start [1/2] (short) (narrow) %v1891_v15, 32 }
 0x313   :  { %v497_v46 = vmul.f32 0.5, %v485_v41  ;;  %v489_v47 = vadd.f32 %v488_v45, %v422_v43  ;;  %v490_v48 = vpop.f32.mrb[15].mxu1  ;;  %v1897_v41 = vld [vmem:[%s2028_s2 + $0x38] sm:$0xff]   ;;  %s1527_s2 = smov [#allocation2]  }
 0x314   :  { %v498_v49 = vmul.f32 0.5, %v487_v44  ;;  %v491_v50 = vadd.f32 %v490_v48, %v422_v43  ;;  %v542_v44 = vpop.permute.xlu1 %541  ;;  %s1327_s21 = sshll.u32 %s1527_s2, 4  ;;  %s1328_s21 = int_to_ptr.vmem [resolvable:$true] %s1327_s21 }
 0x315   :  { %1462 = vtanh.f32 %v497_v46  ;;  %v499_v51 = vmul.f32 0.5, %v489_v47  ;;  %s1502_s22 = scalar_lea.vmem %s1328_s21, 256  ;;  %p1507_p1 = scmp.lt.s32.totalorder %s1328_s21, %s1328_s21 }
 0x316   :  { %1464 = vtanh.f32 %v498_v49  ;;  %v500_v52 = vmul.f32 0.5, %v491_v50  ;;  %840 = vxpose.xlu0.c.b16.end [2/2] (short) (narrow) %v1897_v41, 32  ;;  %p1503_p0 = scmp.ne.s32.totalorder %s1328_s21, %s1502_s22  ;;  %p1508_p2 = scmp.lt.s32.totalorder %s1502_s22, %s1502_s22 }
 0x317   :  { %v1455_v53 = vpop.eup %1454  ;;  %1466 = vtanh.f32 %v499_v51 }
 0x318   :  { %v1457_v62 = vpop.eup %1456  ;;  %1468 = vtanh.f32 %v500_v52  ;;  %v509_v2 = vadd.f32 1.0, %v1455_v53  ;;  %p1509_p3 = por %p1508_p2, %p1507_p1 }
 0x319   :  { %v1459_v63 = vpop.eup %1458  ;;  %v510_v0 = vadd.f32 1.0, %v1457_v62  ;;  %v552_v62 = vpop.permute.xlu1 %551 }
 0x31a   :  { %v1461_v1 = vpop.eup %1460  ;;  %v511_v3 = vadd.f32 1.0, %v1459_v63  ;;  %v1864_v21 = vmul.f32 0.5, %v509_v2  ;;  %1049 = vxpose.xlu0.c.b16.start [1/2] (short) (narrow) %v1831_v23, 32  ;;  %p1510_p4 = pnand %p1509_p3, %p1503_p0 }
 0x31b   :  { %v512_v4 = vadd.f32 1.0, %v1461_v1  ;;  %v1860_v6 = vmul.f32 0.5, %v510_v0 }
 0x31c   :  { %v1858_v5 = vmul.f32 0.5, %v511_v3 }
 0x31d   :  { %v1862_v12 = vmul.f32 0.5, %v512_v4 }
 0x31e   :  { %v525_v29 = vpack.c.bf16 %v1858_v5, %v1864_v21  ;;  %1050 = vxpose.xlu0.c.b16.end [2/2] (short) (narrow) %v1839_v24, 32 }
 0x31f   :  { %v1463_v22 = vpop.eup %1462  ;;  %v526_v27 = vpack.c.bf16 %v1862_v12, %v1860_v6 }
 0x320   :  { %v1465_v28 = vpop.eup %1464  ;;  %v513_v33 = vadd.f32 1.0, %v1463_v22 }
 0x321   :  { %v1467_v30 = vpop.eup %1466  ;;  %v514_v31 = vadd.f32 1.0, %v1465_v28  ;;  %570 = vmatprep.subr.bf16.mxu1 %v526_v27 }
 0x322   :  { %v1469_v32 = vpop.eup %1468  ;;  %v515_v34 = vadd.f32 1.0, %v1467_v30  ;;  %571 = vmatpush1.bf16.msra.mxu1 %v525_v29  ;;  %v1876_v39 = vmul.f32 0.5, %v513_v33  ;;  %1259 = vxpose.xlu0.c.b16.start [1/2] (short) (narrow) %v1604_v20, 16 }
 0x323   :  { %v516_v35 = vadd.f32 1.0, %v1469_v32  ;;  %v1872_v37 = vmul.f32 0.5, %v514_v31 }
 0x324   :  { %v1870_v36 = vmul.f32 0.5, %v515_v34 }
 0x325   :  { %v1874_v38 = vmul.f32 0.5, %v516_v35 }
 0x326   :  { %v527_v14 = vpack.c.bf16 %v1870_v36, %v1876_v39  ;;  %1260 = vxpose.xlu0.c.b16.end [2/2] (short) (narrow) %v1755_v19, 16 }
 0x327   :  { %v528_v40 = vpack.c.bf16 %v1874_v38, %v1872_v37 }
 0x329   :  { %572 = vmatprep.subr.bf16.mxu1 %v528_v40 }
 0x32a   :  { %573 = vmatpush1.bf16.msra.mxu1 %v527_v14 }
 0x32d   :  { %1361 = vmatmul.mubr.msk.bf16.vlgmr.msra.gmra.mrb[16].mxu1 %vm303_vm1, %v1847_v25  ;;  %v537_v25 = vpop.permute.xlu0 %536 }
 0x32e   :  { %612 = vmatprep.mubr.bf16.mxu1 %v1526_v7 }
 0x331   :  { %v547_v20 = vpop.permute.xlu0 %546 }
 0x335   :  { %1362 = vmatmul.mubr.msk.bf16.gmra.mrb[20].mxu1 %vm303_vm1, %v1853_v26 }
 0x336   :  { %732 = vmatprep.mubr.bf16.mxu1 %v1526_v7 }
 0x400   :  { %v604_v26 = vpop.f32.mrb[16].mxu1 }
 0x401   :  { %v605_v42 = vadd.f32 %v604_v26, %v537_v25  ;;  %v606_v43 = vpop.f32.mrb[17].mxu1 }
 0x402   :  { %v607_v45 = vadd.f32 %v606_v43, %v537_v25  ;;  %v608_v46 = vpop.f32.mrb[18].mxu1 }
 0x403   :  { %v623_v47 = vmul.f32 0.5, %v605_v42  ;;  %v609_v48 = vadd.f32 %v608_v46, %v542_v44  ;;  %v610_v49 = vpop.f32.mrb[19].mxu1 }
 0x404   :  { %v624_v50 = vmul.f32 0.5, %v607_v45  ;;  %v611_v51 = vadd.f32 %v610_v49, %v542_v44 }
 0x405   :  { %1470 = vtanh.f32 %v623_v47  ;;  %v625_v23 = vmul.f32 0.5, %v609_v48 }
 0x406   :  { %1472 = vtanh.f32 %v624_v50  ;;  %v626_v24 = vmul.f32 0.5, %v611_v51 }
 0x407   :  { %1474 = vtanh.f32 %v625_v23 }
 0x408   :  { %1476 = vtanh.f32 %v626_v24  ;;  %v614_v19 = vpop.f32.mrb[20].mxu1 }
 0x409   :  { %v615_v52 = vadd.f32 %v614_v19, %v547_v20  ;;  %v616_v53 = vpop.f32.mrb[21].mxu1 }
 0x40a   :  { %v617_v63 = vadd.f32 %v616_v53, %v547_v20  ;;  %v618_v0 = vpop.f32.mrb[22].mxu1 }
 0x40b   :  { %v627_v1 = vmul.f32 0.5, %v615_v52  ;;  %v619_v2 = vadd.f32 %v618_v0, %v552_v62  ;;  %v620_v3 = vpop.f32.mrb[23].mxu1 }
 0x40c   :  { %v628_v4 = vmul.f32 0.5, %v617_v63  ;;  %v621_v22 = vadd.f32 %v620_v3, %v552_v62  ;;  %v667_v63 = vpop.permute.xlu0 %666  ;;  %v672_v3 = vpop.permute.xlu1 %671 }
 0x40d   :  { %1478 = vtanh.f32 %v627_v1  ;;  %v629_v27 = vmul.f32 0.5, %v619_v2 }
 0x40e   :  { %1480 = vtanh.f32 %v628_v4  ;;  %v630_v28 = vmul.f32 0.5, %v621_v22 }
 0x40f   :  { %v1471_v29 = vpop.eup %1470  ;;  %1482 = vtanh.f32 %v629_v27 }
 0x410   :  { %v1473_v30 = vpop.eup %1472  ;;  %1484 = vtanh.f32 %v630_v28  ;;  %v639_v34 = vadd.f32 1.0, %v1471_v29 }
 0x411   :  { %v1475_v31 = vpop.eup %1474  ;;  %v640_v32 = vadd.f32 1.0, %v1473_v30 }
 0x412   :  { %v1477_v33 = vpop.eup %1476  ;;  %v641_v35 = vadd.f32 1.0, %v1475_v31  ;;  %v1910_v42 = vmul.f32 0.5, %v639_v34 }
 0x413   :  { %v642_v40 = vadd.f32 1.0, %v1477_v33  ;;  %v1906_v25 = vmul.f32 0.5, %v640_v32 }
 0x414   :  { %v1904_v14 = vmul.f32 0.5, %v641_v35 }
 0x415   :  { %v1908_v26 = vmul.f32 0.5, %v642_v40  ;;  %v682_v40 = vpop.permute.xlu1 %681 }
 0x416   :  { %v655_v46 = vpack.c.bf16 %v1904_v14, %v1910_v42 }
 0x417   :  { %v1479_v43 = vpop.eup %1478  ;;  %v656_v44 = vpack.c.bf16 %v1908_v26, %v1906_v25 }
 0x418   :  { %v1481_v45 = vpop.eup %1480  ;;  %v643_v50 = vadd.f32 1.0, %v1479_v43 }
 0x419   :  { %v1483_v47 = vpop.eup %1482  ;;  %v644_v48 = vadd.f32 1.0, %v1481_v45  ;;  %700 = vmatprep.subr.bf16.mxu1 %v656_v44 }
 0x41a   :  { %v1485_v49 = vpop.eup %1484  ;;  %v645_v51 = vadd.f32 1.0, %v1483_v47  ;;  %701 = vmatpush1.bf16.msra.mxu1 %v655_v46  ;;  %v1922_v52 = vmul.f32 0.5, %v643_v50 }
 0x41b   :  { %v646_v23 = vadd.f32 1.0, %v1485_v49  ;;  %v1918_v20 = vmul.f32 0.5, %v644_v48 }
 0x41c   :  { %v1916_v24 = vmul.f32 0.5, %v645_v51 }
 0x41d   :  { %v1920_v19 = vmul.f32 0.5, %v646_v23 }
 0x41e   :  { %v657_v62 = vpack.c.bf16 %v1916_v24, %v1922_v52 }
 0x41f   :  { %v658_v53 = vpack.c.bf16 %v1920_v19, %v1918_v20 }
 0x421   :  { %702 = vmatprep.subr.bf16.mxu1 %v658_v53 }
 0x422   :  { %703 = vmatpush1.bf16.msra.mxu1 %v657_v62 }
 0x425   :  { %1369 = vmatmul.mubr.msk.bf16.vlgmr.msra.gmra.mrb[24].mxu1 %vm303_vm1, %v1891_v15 }
 0x426   :  { %742 = vmatprep.mubr.bf16.mxu1 %v1526_v7 }
 0x42d   :  { %1370 = vmatmul.mubr.msk.bf16.gmra.mrb[28].mxu1 %vm303_vm1, %v1897_v41  ;;  %v677_v41 = vpop.permute.xlu0 %676 }
 0x42e   :  { %893 = vmatprep.mubr.bf16.mxu1 %v1526_v7 }
 0x4f8   :  { %v734_v0 = vpop.f32.mrb[24].mxu1 }
 0x4f9   :  { %v735_v1 = vadd.f32 %v734_v0, %v667_v63  ;;  %v736_v2 = vpop.f32.mrb[25].mxu1 }
 0x4fa   :  { %v737_v4 = vadd.f32 %v736_v2, %v667_v63  ;;  %v738_v22 = vpop.f32.mrb[26].mxu1 }
 0x4fb   :  { %v753_v27 = vmul.f32 0.5, %v735_v1  ;;  %v739_v28 = vadd.f32 %v738_v22, %v672_v3  ;;  %v740_v29 = vpop.f32.mrb[27].mxu1 }
 0x4fc   :  { %v754_v30 = vmul.f32 0.5, %v737_v4  ;;  %v741_v31 = vadd.f32 %v740_v29, %v672_v3  ;;  %v792_v4 = vpop.permute.xlu0 %791 }
 0x4fd   :  { %1486 = vtanh.f32 %v753_v27  ;;  %v755_v15 = vmul.f32 0.5, %v739_v28 }
 0x4fe   :  { %1488 = vtanh.f32 %v754_v30  ;;  %v756_v32 = vmul.f32 0.5, %v741_v31  ;;  %v797_v31 = vpop.permute.xlu1 %796 }
 0x4ff   :  { %1490 = vtanh.f32 %v755_v15 }
 0x500   :  { %1492 = vtanh.f32 %v756_v32  ;;  %v744_v33 = vpop.f32.mrb[28].mxu1 }
 0x501   :  { %v745_v34 = vadd.f32 %v744_v33, %v677_v41  ;;  %v746_v35 = vpop.f32.mrb[29].mxu1 }
 0x502   :  { %v747_v43 = vadd.f32 %v746_v35, %v677_v41  ;;  %v748_v44 = vpop.f32.mrb[30].mxu1 }
 0x503   :  { %v757_v45 = vmul.f32 0.5, %v745_v34  ;;  %v749_v46 = vadd.f32 %v748_v44, %v682_v40  ;;  %v750_v47 = vpop.f32.mrb[31].mxu1 }
 0x504   :  { %v758_v48 = vmul.f32 0.5, %v747_v43  ;;  %v751_v49 = vadd.f32 %v750_v47, %v682_v40 }
 0x505   :  { %1494 = vtanh.f32 %v757_v45  ;;  %v759_v50 = vmul.f32 0.5, %v749_v46 }
 0x506   :  { %1496 = vtanh.f32 %v758_v48  ;;  %v760_v51 = vmul.f32 0.5, %v751_v49 }
 0x507   :  { %v1487_v23 = vpop.eup %1486  ;;  %1498 = vtanh.f32 %v759_v50 }
 0x508   :  { %v1489_v53 = vpop.eup %1488  ;;  %v769_v62 = vadd.f32 1.0, %v1487_v23  ;;  %1500 = vtanh.f32 %v760_v51 }
 0x509   :  { %v1491_v63 = vpop.eup %1490  ;;  %v770_v0 = vadd.f32 1.0, %v1489_v53 }
 0x50a   :  { %v1493_v1 = vpop.eup %1492  ;;  %v777_v2 = vmul.f32 0.5, %v769_v62  ;;  %v771_v3 = vadd.f32 1.0, %v1491_v63 }
 0x50b   :  { %v778_v22 = vmul.f32 0.5, %v770_v0  ;;  %v772_v27 = vadd.f32 1.0, %v1493_v1  ;;  %v802_v0 = vpop.permute.xlu0 %801 }
 0x50c   :  { %v809_v28 = vmul.f32 %v792_v4, %v777_v2  ;;  %v817_v29 = vsub.f32 1.0, %v777_v2  ;;  %v779_v30 = vmul.f32 0.5, %v771_v3 }
 0x50d   :  { %v810_v15 = vmul.f32 %v792_v4, %v778_v22  ;;  %v818_v32 = vsub.f32 1.0, %v778_v22  ;;  %v780_v41 = vmul.f32 0.5, %v772_v27 }
 0x50e   :  { %v811_v33 = vmul.f32 %v797_v31, %v779_v30  ;;  %v819_v34 = vsub.f32 1.0, %v779_v30  ;;  %v825_v45 = vmul.f32 %v817_v29, %v809_v28  ;;  %v807_v30 = vpop.permute.xlu1 %806 }
 0x50f   :  { %v1495_v35 = vpop.eup %1494  ;;  %v812_v40 = vmul.f32 %v797_v31, %v780_v41  ;;  %v820_v43 = vsub.f32 1.0, %v780_v41  ;;  %v826_v50 = vmul.f32 %v818_v32, %v810_v15 }
 0x510   :  { %v1497_v44 = vpop.eup %1496  ;;  %v827_v46 = vmul.f32 %v819_v34, %v811_v33  ;;  %v773_v47 = vadd.f32 1.0, %v1495_v35 }
 0x511   :  { %v1499_v48 = vpop.eup %1498  ;;  %v774_v49 = vadd.f32 1.0, %v1497_v44  ;;  %v828_v51 = vmul.f32 %v820_v43, %v812_v40 }
 0x512   :  { %v1501_v23 = vpop.eup %1500  ;;  %v781_v53 = vmul.f32 0.5, %v773_v47  ;;  %v775_v62 = vadd.f32 1.0, %v1499_v48  ;;  %v833_v63 = vpack.c.bf16 %v827_v46, %v825_v45  ;;  %v847_v46 = vpop.trf.xlu0 }
 0x513   :  { %v782_v1 = vmul.f32 0.5, %v774_v49  ;;  %v776_v2 = vadd.f32 1.0, %v1501_v23  ;;  %v834_v3 = vpack.c.bf16 %v828_v51, %v826_v50 }
 0x514   :  { %v813_v4 = vmul.f32 %v802_v0, %v781_v53  ;;  %v821_v22 = vsub.f32 1.0, %v781_v53  ;;  %v783_v27 = vmul.f32 0.5, %v775_v62  ;;  %v922_v53 = vsub.f32 1.0, %v1910_v42 }
 0x515   :  { %v814_v31 = vmul.f32 %v802_v0, %v782_v1  ;;  %v822_v28 = vsub.f32 1.0, %v782_v1  ;;  %v784_v29 = vmul.f32 0.5, %v776_v2  ;;  %861 = vmatprep.subr.bf16.mxu1 %v834_v3  ;;  %v923_v1 = vsub.f32 1.0, %v1906_v25 }
 0x516   :  { %v815_v41 = vmul.f32 %v807_v30, %v783_v27  ;;  %v823_v33 = vsub.f32 1.0, %v783_v27  ;;  %862 = vmatpush1.bf16.msra.mxu1 %v833_v63  ;;  %v829_v34 = vmul.f32 %v821_v22, %v813_v4  ;;  %v848_v47 = vpop.trf.xlu0  ;;  %v924_v63 = vsub.f32 1.0, %v1904_v14 }
 0x517   :  { %v816_v15 = vmul.f32 %v807_v30, %v784_v29  ;;  %v824_v32 = vsub.f32 1.0, %v784_v29  ;;  %v830_v40 = vmul.f32 %v822_v28, %v814_v31  ;;  %v925_v3 = vsub.f32 1.0, %v1908_v26 }
 0x518   :  { %v831_v35 = vmul.f32 %v823_v33, %v815_v41 }
 0x519   :  { %v832_v43 = vmul.f32 %v824_v32, %v816_v15 }
 0x51a   :  { %v835_v44 = vpack.c.bf16 %v831_v35, %v829_v34  ;;  %v927_v34 = vsub.f32 1.0, %v1918_v20 }
 0x51b   :  { %v836_v45 = vpack.c.bf16 %v832_v43, %v830_v40  ;;  %v929_v40 = vsub.f32 1.0, %v1920_v19 }
 0x51d   :  { %863 = vmatprep.subr.bf16.mxu1 %v836_v45 }
 0x51e   :  { %864 = vmatpush1.bf16.msra.mxu1 %v835_v44 }
 0x521   :  { %1371 = vmatmul.mubr.msk.bf16.vlgmr.msra.gmra.mrb[32].mxu1 %vm303_vm1, %v847_v46 }
 0x522   :  { %903 = vmatprep.mubr.bf16.mxu1 %v1526_v7 }
 0x529   :  { %1372 = vmatmul.mubr.msk.bf16.gmra.mrb[36].mxu1 %vm303_vm1, %v848_v47 }
 0x52a   :  { %1103 = vmatprep.mubr.bf16.mxu1 %v1526_v7 }
 0x5f4   :  { %v895_v48 = vpop.f32.mrb[32].mxu1 }
 0x5f5   :  { %v914_v49 = vmul.f32 %v895_v48, %v1910_v42  ;;  %v897_v50 = vpop.f32.mrb[33].mxu1 }
 0x5f6   :  { %v915_v51 = vmul.f32 %v897_v50, %v1906_v25  ;;  %v899_v23 = vpop.f32.mrb[34].mxu1  ;;  %v926_v25 = vsub.f32 1.0, %v1922_v52 }
 0x5f7   :  { %v916_v62 = vmul.f32 %v899_v23, %v1904_v14  ;;  %v901_v0 = vpop.f32.mrb[35].mxu1  ;;  %v930_v4 = vmul.f32 %v922_v53, %v914_v49  ;;  %v1027_v23 = vsub.f32 1.0, %v1864_v21 }
 0x5f8   :  { %v917_v2 = vmul.f32 %v901_v0, %v1908_v26  ;;  %v931_v27 = vmul.f32 %v923_v1, %v915_v51  ;;  %v928_v26 = vsub.f32 1.0, %v1916_v24  ;;  %v1028_v0 = vsub.f32 1.0, %v1860_v6 }
 0x5f9   :  { %v932_v22 = vmul.f32 %v924_v63, %v916_v62  ;;  %v1029_v62 = vsub.f32 1.0, %v1858_v5 }
 0x5fa   :  { %v933_v30 = vmul.f32 %v925_v3, %v917_v2  ;;  %v1030_v2 = vsub.f32 1.0, %v1862_v12 }
 0x5fb   :  { %v938_v31 = vpack.c.bf16 %v932_v22, %v930_v4 }
 0x5fc   :  { %v905_v28 = vpop.f32.mrb[36].mxu1  ;;  %v939_v29 = vpack.c.bf16 %v933_v30, %v931_v27 }
 0x5fd   :  { %v918_v42 = vmul.f32 %v905_v28, %v1922_v52  ;;  %v907_v41 = vpop.f32.mrb[37].mxu1  ;;  %v952_v52 = vpop.trf.xlu1 }
 0x5fe   :  { %v919_v33 = vmul.f32 %v907_v41, %v1918_v20  ;;  %v909_v14 = vpop.f32.mrb[38].mxu1  ;;  %966 = vmatprep.subr.bf16.mxu0 %v939_v29 }
 0x5ff   :  { %v920_v15 = vmul.f32 %v909_v14, %v1916_v24  ;;  %v911_v32 = vpop.f32.mrb[39].mxu1  ;;  %967 = vmatpush1.bf16.msra.mxu0 %v938_v31  ;;  %v934_v43 = vmul.f32 %v926_v25, %v918_v42  ;;  %v1032_v14 = vsub.f32 1.0, %v1872_v37 }
 0x600   :  { %v921_v35 = vmul.f32 %v911_v32, %v1920_v19  ;;  %v935_v45 = vmul.f32 %v927_v34, %v919_v33 }
 0x601   :  { %v936_v44 = vmul.f32 %v928_v26, %v920_v15  ;;  %v953_v24 = vpop.trf.xlu1  ;;  %v1034_v15 = vsub.f32 1.0, %v1874_v38 }
 0x602   :  { %v937_v46 = vmul.f32 %v929_v40, %v921_v35 }
 0x603   :  { %v940_v47 = vpack.c.bf16 %v936_v44, %v934_v43 }
 0x604   :  { %v941_v48 = vpack.c.bf16 %v937_v46, %v935_v45 }
 0x606   :  { %968 = vmatprep.subr.bf16.mxu0 %v941_v48 }
 0x607   :  { %969 = vmatpush1.bf16.msra.mxu0 %v940_v47  ;;  %v1132_v47 = vsub.f32 1.0, %v1810_v61 }
 0x60a   :  { %1373 = vmatmul.mubr.msk.bf16.vlgmr.msra.gmra.mrb[8].mxu0 %vm303_vm1, %v952_v52  ;;  %v1134_v52 = vsub.f32 1.0, %v1804_v54 }
 0x60b   :  { %1008 = vmatprep.mubr.bf16.mxu0 %v1526_v7 }
 0x612   :  { %1374 = vmatmul.mubr.msk.bf16.gmra.mrb[12].mxu0 %vm303_vm1, %v953_v24 }
 0x613   :  { %1208 = vmatprep.mubr.bf16.mxu0 %v1526_v7 }
 0x6dd   :  { %v1000_v20 = vpop.f32.mrb[8].mxu0 }
 0x6de   :  { %v1019_v19 = vmul.f32 %v1000_v20, %v1864_v21  ;;  %v1002_v49 = vpop.f32.mrb[9].mxu0  ;;  %v1133_v20 = vsub.f32 1.0, %v1806_v55 }
 0x6df   :  { %v1020_v50 = vmul.f32 %v1002_v49, %v1860_v6  ;;  %v1004_v51 = vpop.f32.mrb[10].mxu0  ;;  %v1031_v6 = vsub.f32 1.0, %v1876_v39  ;;  %v1135_v49 = vsub.f32 1.0, %v1808_v56 }
 0x6e0   :  { %v1021_v53 = vmul.f32 %v1004_v51, %v1858_v5  ;;  %v1006_v63 = vpop.f32.mrb[11].mxu0  ;;  %v1035_v3 = vmul.f32 %v1027_v23, %v1019_v19 }
 0x6e1   :  { %v1022_v1 = vmul.f32 %v1006_v63, %v1862_v12  ;;  %v1036_v22 = vmul.f32 %v1028_v0, %v1020_v50  ;;  %v1033_v12 = vsub.f32 1.0, %v1870_v36 }
 0x6e2   :  { %v1037_v4 = vmul.f32 %v1029_v62, %v1021_v53 }
 0x6e3   :  { %v1038_v27 = vmul.f32 %v1030_v2, %v1022_v1 }
 0x6e4   :  { %v1043_v30 = vpack.c.bf16 %v1037_v4, %v1035_v3 }
 0x6e5   :  { %v1010_v31 = vpop.f32.mrb[12].mxu0  ;;  %v1044_v28 = vpack.c.bf16 %v1038_v27, %v1036_v22  ;;  %v1137_v22 = vsub.f32 1.0, %v1818_v16 }
 0x6e6   :  { %v1023_v21 = vmul.f32 %v1010_v31, %v1876_v39  ;;  %v1012_v29 = vpop.f32.mrb[13].mxu0  ;;  %v1057_v39 = vpop.trf.xlu0 }
 0x6e7   :  { %v1024_v42 = vmul.f32 %v1012_v29, %v1872_v37  ;;  %v1014_v5 = vpop.f32.mrb[14].mxu0  ;;  %1071 = vmatprep.subr.bf16.mxu1 %v1044_v28 }
 0x6e8   :  { %v1025_v41 = vmul.f32 %v1014_v5, %v1870_v36  ;;  %v1016_v33 = vpop.f32.mrb[15].mxu0  ;;  %1072 = vmatpush1.bf16.msra.mxu1 %v1043_v30  ;;  %v1039_v26 = vmul.f32 %v1031_v6, %v1023_v21  ;;  %v1139_v30 = vsub.f32 1.0, %v1820_v17 }
 0x6e9   :  { %v1026_v25 = vmul.f32 %v1016_v33, %v1874_v38  ;;  %v1040_v34 = vmul.f32 %v1032_v14, %v1024_v42  ;;  %v1237_v33 = vsub.f32 1.0, %v1770_v60 }
 0x6ea   :  { %v1041_v32 = vmul.f32 %v1033_v12, %v1025_v41  ;;  %v1058_v36 = vpop.trf.xlu0 }
 0x6eb   :  { %v1042_v35 = vmul.f32 %v1034_v15, %v1026_v25  ;;  %v1239_v25 = vsub.f32 1.0, %v1764_v57 }
 0x6ec   :  { %v1045_v40 = vpack.c.bf16 %v1041_v32, %v1039_v26  ;;  %v1238_v26 = vsub.f32 1.0, %v1766_v58  ;;  %v1240_v32 = vsub.f32 1.0, %v1768_v59 }
 0x6ed   :  { %v1046_v43 = vpack.c.bf16 %v1042_v35, %v1040_v34 }
 0x6ef   :  { %1073 = vmatprep.subr.bf16.mxu1 %v1046_v43 }
 0x6f0   :  { %1074 = vmatpush1.bf16.msra.mxu1 %v1045_v40 }
 0x6f3   :  { %1375 = vmatmul.mubr.msk.bf16.vlgmr.msra.gmra.mrb[40].mxu1 %vm303_vm1, %v1057_v39 }
 0x6f4   :  { %1113 = vmatprep.mubr.bf16.mxu1 %v1526_v7 }
 0x6fb   :  { %1376 = vmatmul.mubr.msk.bf16.gmra.mrb[44].mxu1 %vm303_vm1, %v1058_v36 }
 0x6fc   :  { %1310 = vmatprep.mubr.bf16.mxu1 %v1526_v7 }
 0x7c6   :  { %v1105_v37 = vpop.f32.mrb[40].mxu1 }
 0x7c7   :  { %v1124_v38 = vmul.f32 %v1105_v37, %v1810_v61  ;;  %v1107_v44 = vpop.f32.mrb[41].mxu1 }
 0x7c8   :  { %v1125_v45 = vmul.f32 %v1107_v44, %v1806_v55  ;;  %v1109_v46 = vpop.f32.mrb[42].mxu1  ;;  %v1136_v55 = vsub.f32 1.0, %v1822_v18 }
 0x7c9   :  { %v1126_v48 = vmul.f32 %v1109_v46, %v1804_v54  ;;  %v1111_v24 = vpop.f32.mrb[43].mxu1  ;;  %v1140_v50 = vmul.f32 %v1132_v47, %v1124_v38  ;;  %v1242_v47 = vsub.f32 1.0, %v1778_v9 }
 0x7ca   :  { %v1127_v19 = vmul.f32 %v1111_v24, %v1808_v56  ;;  %v1141_v23 = vmul.f32 %v1133_v20, %v1125_v45  ;;  %v1138_v56 = vsub.f32 1.0, %v1816_v13 }
 0x7cb   :  { %v1142_v51 = vmul.f32 %v1134_v52, %v1126_v48  ;;  %v1244_v52 = vsub.f32 1.0, %v1780_v10 }
 0x7cc   :  { %v1143_v53 = vmul.f32 %v1135_v49, %v1127_v19 }
 0x7cd   :  { %v1148_v62 = vpack.c.bf16 %v1142_v51, %v1140_v50 }
 0x7ce   :  { %v1115_v63 = vpop.f32.mrb[44].mxu1  ;;  %v1149_v0 = vpack.c.bf16 %v1143_v53, %v1141_v23 }
 0x7cf   :  { %v1128_v61 = vmul.f32 %v1115_v63, %v1822_v18  ;;  %v1117_v1 = vpop.f32.mrb[45].mxu1  ;;  %v1162_v18 = vpop.trf.xlu1 }
 0x7d0   :  { %v1129_v2 = vmul.f32 %v1117_v1, %v1818_v16  ;;  %v1119_v54 = vpop.f32.mrb[46].mxu1  ;;  %1176 = vmatprep.subr.bf16.mxu0 %v1149_v0 }
 0x7d1   :  { %v1130_v3 = vmul.f32 %v1119_v54, %v1816_v13  ;;  %v1121_v4 = vpop.f32.mrb[47].mxu1  ;;  %1177 = vmatpush1.bf16.msra.mxu0 %v1148_v62  ;;  %v1144_v31 = vmul.f32 %v1136_v55, %v1128_v61 }
 0x7d2   :  { %v1131_v27 = vmul.f32 %v1121_v4, %v1820_v17  ;;  %v1145_v21 = vmul.f32 %v1137_v22, %v1129_v2 }
 0x7d3   :  { %v1146_v28 = vmul.f32 %v1138_v56, %v1130_v3  ;;  %v1163_v13 = vpop.trf.xlu1 }
 0x7d4   :  { %v1147_v29 = vmul.f32 %v1139_v30, %v1131_v27 }
 0x7d5   :  { %v1150_v42 = vpack.c.bf16 %v1146_v28, %v1144_v31 }
 0x7d6   :  { %v1151_v5 = vpack.c.bf16 %v1147_v29, %v1145_v21 }
 0x7d8   :  { %1178 = vmatprep.subr.bf16.mxu0 %v1151_v5 }
 0x7d9   :  { %1179 = vmatpush1.bf16.msra.mxu0 %v1150_v42 }
 0x7dc   :  { %1377 = vmatmul.mubr.msk.bf16.vlgmr.msra.gmra.mrb[16].mxu0 %vm303_vm1, %v1162_v18 }
 0x7dd   :  { %1218 = vmatprep.mubr.bf16.mxu0 %v1526_v7 }
 0x7e4   :  { %1378 = vmatmul.mubr.msk.bf16.gmra.mrb[20].mxu0 %vm303_vm1, %v1163_v13 }
 0x8af   :  { %v1210_v16 = vpop.f32.mrb[16].mxu0 }
 0x8b0   :  { %v1229_v6 = vmul.f32 %v1210_v16, %v1770_v60  ;;  %v1212_v17 = vpop.f32.mrb[17].mxu0 }
 0x8b1   :  { %v1230_v41 = vmul.f32 %v1212_v17, %v1766_v58  ;;  %v1214_v12 = vpop.f32.mrb[18].mxu0  ;;  %v1241_v58 = vsub.f32 1.0, %v1782_v11 }
 0x8b2   :  { %v1231_v14 = vmul.f32 %v1214_v12, %v1764_v57  ;;  %v1216_v15 = vpop.f32.mrb[19].mxu0  ;;  %v1245_v34 = vmul.f32 %v1237_v33, %v1229_v6 }
 0x8b3   :  { %v1232_v7 = vmul.f32 %v1216_v15, %v1768_v59  ;;  %v1246_v40 = vmul.f32 %v1238_v26, %v1230_v41  ;;  %v1243_v59 = vsub.f32 1.0, %v1776_v8 }
 0x8b4   :  { %v1247_v35 = vmul.f32 %v1239_v25, %v1231_v14 }
 0x8b5   :  { %v1248_v43 = vmul.f32 %v1240_v32, %v1232_v7 }
 0x8b6   :  { %v1253_v39 = vpack.c.bf16 %v1247_v35, %v1245_v34 }
 0x8b7   :  { %v1220_v36 = vpop.f32.mrb[20].mxu0  ;;  %v1254_v37 = vpack.c.bf16 %v1248_v43, %v1246_v40 }
 0x8b8   :  { %v1233_v60 = vmul.f32 %v1220_v36, %v1782_v11  ;;  %v1222_v38 = vpop.f32.mrb[21].mxu0  ;;  %v1267_v11 = vpop.trf.xlu0 }
 0x8b9   :  { %v1234_v44 = vmul.f32 %v1222_v38, %v1778_v9  ;;  %v1224_v57 = vpop.f32.mrb[22].mxu0  ;;  %1278 = vmatprep.subr.bf16.mxu1 %v1254_v37 }
 0x8ba   :  { %v1235_v45 = vmul.f32 %v1224_v57, %v1776_v8  ;;  %v1226_v46 = vpop.f32.mrb[23].mxu0  ;;  %1279 = vmatpush1.bf16.msra.mxu1 %v1253_v39  ;;  %v1249_v24 = vmul.f32 %v1241_v58, %v1233_v60 }
 0x8bb   :  { %v1236_v48 = vmul.f32 %v1226_v46, %v1780_v10  ;;  %v1250_v19 = vmul.f32 %v1242_v47, %v1234_v44 }
 0x8bc   :  { %v1251_v20 = vmul.f32 %v1243_v59, %v1235_v45 }
 0x8bd   :  { %v1252_v49 = vmul.f32 %v1244_v52, %v1236_v48 }
 0x8be   :  { %v1255_v50 = vpack.c.bf16 %v1251_v20, %v1249_v24 }
 0x8bf   :  { %v1256_v51 = vpack.c.bf16 %v1252_v49, %v1250_v19 }
 0x8c1   :  { %1280 = vmatprep.subr.bf16.mxu1 %v1256_v51 }
 0x8c2   :  { %1281 = vmatpush1.bf16.msra.mxu1 %v1255_v50 }
 0x8c5   :  { %1379 = vmatmul.mubr.msk.bf16.vlgmr.msra.gmra.mrb[48].mxu1 %vm303_vm1, %v1267_v11 }
 0x998   :  { %v1312_v8 = vpop.f32.mrb[48].mxu1 }
 0x999   :  { %1319 = vst [vmem:[#allocation2] sm:$0xff] %v1312_v8  ;;  %v1314_v9 = vpop.f32.mrb[49].mxu1 }
 0x99a   :  { %1320 = vst [vmem:[#allocation2 + $0x8] sm:$0xff] %v1314_v9  ;;  %v1316_v23 = vpop.f32.mrb[50].mxu1 }
 0x99b   :  { %v1317_v10 = vpop.f32.mrb[51].mxu1 }
 0x99c   :  { %1513 = shalt.err (!%p1510_p4)
}
 0x99d   :  { %s1514_s25 = scalar_lea.hbm %s2031_s5, 256 }
 0x99e   :  { %p1515_p5 = scmp.ne.s32.totalorder %s2031_s5, %s1514_s25  ;;  %p1518_p6 = scmp.lt.u32.totalorder %s1514_s25, %s2031_s5 }
 0x9a0   :  { %p1520_p7 = pnand %p1518_p6, %p1515_p5 }
 0x9a2   :  { %1523 = shalt.err (!%p1520_p7)
}
 0x9a3   :  { %1330 = dma.vmem_to_hbm [thread:$0]  %s1328_s21, 256, %s2031_s5, [#allocation3]  }
 0x9a4   :  { %1524 = dma.done.wait [#allocation3], 256  }
 0x9a5   :  { %1525 = vsyncadd [#allocation3], 4294967040 }
 0x9a6   :  { %1334 = vsyncpa [#allocation3], 1 }

</bundles_post_ra>
